<compile_context>
chip_gen: v6e
topology: v6e:2x2x1
jax: 0.10.0
libtpu: 0.0.40
codegen_flags: <defaults>
</compile_context>

<pallas_src>
import functools

import jax
import jax.numpy as jnp
from jax.experimental import pallas as pl
from jax.experimental.pallas import tpu as pltpu


def _cdiv(a, b):
    return -(-a // b)


def _vae_loss_kernel(xhat_ref, x_ref, mu_ref, logvar_ref, out_ref,
                     mse_acc, kl_acc, *, tiles_per_split, tile_r,
                     rows_valid, needs_mask):
    j = pl.program_id(1)

    @pl.when(j == 0)
    def _init():
        mse_acc[...] = jnp.zeros_like(mse_acc)
        kl_acc[...] = jnp.zeros_like(kl_acc)

    # Cast in-kernel (inputs may be bf16 in HBM); all math in f32, matching
    # the PyTorch .float() semantics.
    x_hat = xhat_ref[...].astype(jnp.float32)
    x = x_ref[...].astype(jnp.float32)
    mu = mu_ref[...].astype(jnp.float32)
    logvar = logvar_ref[...].astype(jnp.float32)

    diff = x_hat - x
    sq = diff * diff
    # "+1" of the KL integrand is hoisted: the wrapper adds the valid element
    # count, so masked/garbage rows can simply be zeroed here.
    kl_c = logvar - mu * mu - jnp.exp(logvar)

    if needs_mask:
        s = pl.program_id(0)
        tile_idx = s * tiles_per_split + j          # UNclamped logical tile id
        row0 = tile_idx * tile_r
        rows = jax.lax.broadcasted_iota(jnp.int32, sq.shape, 0) + row0
        valid = rows < rows_valid
        sq = jnp.where(valid, sq, 0.0)
        kl_c = jnp.where(valid, kl_c, 0.0)

    # Per-step partial reduction into tiny (8, C) accumulators: reshaping the
    # sublane-major rows into groups of 8 keeps (8,128) tiling, so the axis-0
    # sum is pure VALU vreg adds (no XLU, no full-tile scratch RMW).
    groups = tile_r // 8
    c = sq.shape[1]
    mse_acc[...] += sq.reshape(groups, 8, c).sum(axis=0)
    kl_acc[...] += kl_c.reshape(groups, 8, c).sum(axis=0)

    @pl.when(j == pl.num_programs(1) - 1)
    def _finalize():
        out_ref[0, 0] = jnp.sum(mse_acc[...])
        out_ref[0, 1] = jnp.sum(kl_acc[...])


def vae_loss_pallas(x_hat, x, mu, logvar, beta=1.0, tile_rows=None, n_split=None):
    """Scalar VAE loss via a tiled Pallas reduction. Inputs: (batch, state)."""
    assert x_hat.shape == x.shape == mu.shape == logvar.shape
    assert x_hat.ndim == 2
    B, S = x.shape
    N = B * S
    itemsize = jnp.dtype(x_hat.dtype).itemsize

    # --- lane-dense layout: flatten (B,S) -> (R,C) with C % 128 == 0 when
    #     B*S allows it (a contiguous reshape is free in HBM; both loss terms
    #     are global sums, so geometry doesn't matter). -------------------
    R, C, flat = B, S, False
    for cand in (2048, 1024, 512, 256, 128):
        if N % cand == 0 and N // cand >= 8:
            R, C, flat = N // cand, cand, True
            break
    arrays = [x_hat, x, mu, logvar]
    if flat:
        arrays = [a.reshape(R, C) for a in arrays]

    rows_valid = R
    if R < 8:
        # Degenerate tiny problem: pad the sublane dim up to 8 (negligible
        # bytes); padded rows are masked out in-kernel.
        arrays = [jnp.pad(a, ((0, 8 - R), (0, 0))) for a in arrays]
        R = 8

    # --- tiling: ~2 MiB per input block, rounded to the dtype sublane pack;
    #     never larger than the (8-aligned) row count so the last block start
    #     stays in-bounds (ragged tail handled by in-kernel masking). -------
    pack = {4: 8, 2: 16, 1: 32}.get(itemsize, 8)
    if tile_rows is None:
        target_bytes = 2 << 20
        tile_rows = max(pack, (target_bytes // (C * itemsize)) // pack * pack)
    tile_r = int(max(8, min(int(tile_rows), (R // 8) * 8)))
    tile_r = (tile_r // 8) * 8          # accumulator reshape needs %8 == 0

    num_tiles = _cdiv(R, tile_r)
    if n_split is None:
        n_split = 2 if num_tiles >= 4 else 1   # v7x: 2 TCs; harmless elsewhere
    n_split = int(max(1, min(int(n_split), num_tiles)))
    tiles_per_split = _cdiv(num_tiles, n_split)

    needs_mask = (num_tiles * tile_r != rows_valid) or \
                 (n_split * tiles_per_split != num_tiles)

    kernel = functools.partial(
        _vae_loss_kernel,
        tiles_per_split=int(tiles_per_split),
        tile_r=int(tile_r),
        rows_valid=int(rows_valid),
        needs_mask=bool(needs_mask),
    )

    if n_split * tiles_per_split == num_tiles:
        def in_index(sp, j):
            return (sp * tiles_per_split + j, 0)
    else:
        # Uneven split: clamp overhang steps to the last real tile (the mask
        # zeroes their contribution, since the UNclamped logical rows >= R).
        def in_index(sp, j):
            return (jnp.minimum(sp * tiles_per_split + j, num_tiles - 1), 0)

    in_spec = pl.BlockSpec((tile_r, C), in_index)

    partials = pl.pallas_call(
        kernel,
        out_shape=jax.ShapeDtypeStruct((n_split, 2), jnp.float32),
        grid=(n_split, tiles_per_split),
        in_specs=[in_spec, in_spec, in_spec, in_spec],
        out_specs=pl.BlockSpec((1, 2), lambda sp, j: (sp, 0),
                               memory_space=pltpu.SMEM),
        scratch_shapes=[
            pltpu.VMEM((8, C), jnp.float32),   # mse partial (per-core)
            pltpu.VMEM((8, C), jnp.float32),   # kl partial  (per-core)
        ],
        compiler_params=pltpu.CompilerParams(
            dimension_semantics=("parallel", "arbitrary"),
            vmem_limit_bytes=48 * 1024 * 1024,
        ),
        cost_estimate=pl.CostEstimate(
            flops=8 * N,
            transcendentals=N,
            bytes_accessed=4 * N * itemsize + 8 * n_split,
        ),
    )(*arrays)

    # Tiny wrapper-side combine (few scalar ops).
    sse = jnp.sum(partials[:, 0])
    kl_raw = jnp.sum(partials[:, 1])
    mse = sse * jnp.float32(1.0 / N)
    # hoisted "+1": add the TRUE element count (masking guarantees only the
    # original B*S elements contribute to kl_raw).
    kl = jnp.float32(-0.5) * (kl_raw + jnp.float32(N)) * jnp.float32(1.0 / B)
    return mse + jnp.float32(beta) * kl


def vae_loss(x_hat, x, mu, logvar, beta=1.0):
    """Size-dispatching wrapper: tiny problems are pure launch/DMA overhead
    for a pallas_call, so let XLA fuse them; otherwise use the tiled kernel."""
    if x.size < (1 << 15):
        return _vae_loss_ref(x_hat, x, mu, logvar, beta=beta)
    return vae_loss_pallas(x_hat, x, mu, logvar, beta=beta)


def _vae_loss_ref(x_hat, x, mu, logvar, beta=1.0):
    """Pure-JAX reference mirroring the PyTorch semantics."""
    x_hat = x_hat.astype(jnp.float32)
    x = x.astype(jnp.float32)
    mu = mu.astype(jnp.float32)
    logvar = logvar.astype(jnp.float32)
    mse = jnp.mean((x_hat - x) ** 2)
    kl = jnp.mean(-0.5 * jnp.sum(1.0 + logvar - mu**2 - jnp.exp(logvar), axis=1))
    return mse + beta * kl


def _make_inputs(key, B, S, dtype=jnp.float32):
    k1, k2, k3, k4 = jax.random.split(key, 4)
    x_hat = jax.random.normal(k1, (B, S), dtype=dtype)
    x = jax.random.normal(k2, (B, S), dtype=dtype)
    mu = (0.1 * jax.random.normal(k3, (B, S))).astype(dtype)
    logvar = (0.1 * jax.random.normal(k4, (B, S))).astype(dtype)
    return x_hat, x, mu, logvar


if __name__ == "__main__":
    # Test 1: basic f32 case (lane-dense flatten, single tile, no mask).
    x_hat, x, mu, logvar = _make_inputs(jax.random.PRNGKey(0), 64, 256)
    loss = jax.block_until_ready(vae_loss_pallas(x_hat, x, mu, logvar, beta=0.5))
    ref = _vae_loss_ref(x_hat, x, mu, logvar, beta=0.5)
    assert jnp.allclose(loss, ref, rtol=1e-5, atol=1e-4), (loss, ref)

    # Test 2: ragged row count + multiple tiles + 2-way split + tail masking.
    x_hat2, x2, mu2, logvar2 = _make_inputs(jax.random.PRNGKey(1), 300, 96)
    loss2 = jax.block_until_ready(
        vae_loss_pallas(x_hat2, x2, mu2, logvar2, beta=1.0, tile_rows=32))
    ref2 = _vae_loss_ref(x_hat2, x2, mu2, logvar2, beta=1.0)
    assert jnp.allclose(loss2, ref2, rtol=1e-5, atol=1e-4), (loss2, ref2)

    # Test 3: uneven split (odd tile count) -> clamped index_map + fully
    # masked duplicate tile.
    x_hat3, x3, mu3, logvar3 = _make_inputs(jax.random.PRNGKey(2), 312, 96)
    loss3 = jax.block_until_ready(
        vae_loss_pallas(x_hat3, x3, mu3, logvar3, beta=2.0, tile_rows=24))
    ref3 = _vae_loss_ref(x_hat3, x3, mu3, logvar3, beta=2.0)
    assert jnp.allclose(loss3, ref3, rtol=1e-5, atol=1e-4), (loss3, ref3)

    # Test 4: bf16 inputs (in-kernel f32 cast, 16-row sublane pack).
    x_hat4, x4, mu4, logvar4 = _make_inputs(jax.random.PRNGKey(3), 128, 512,
                                            dtype=jnp.bfloat16)
    loss4 = jax.block_until_ready(
        vae_loss_pallas(x_hat4, x4, mu4, logvar4, beta=1.0))
    ref4 = _vae_loss_ref(x_hat4, x4, mu4, logvar4, beta=1.0)
    assert jnp.allclose(loss4, ref4, rtol=1e-4, atol=1e-3), (loss4, ref4)

    print("KERNEL_OK")
</pallas_src>

<mosaic_0001>
module attributes {stable_mosaic.version = 11 : i64} {
  func.func @_vae_loss_kernel(%arg0: i32, %arg1: i32, %arg2: memref<8x2048xf32, #tpu.memory_space<vmem>>, %arg3: memref<8x2048xf32, #tpu.memory_space<vmem>>, %arg4: memref<8x2048xf32, #tpu.memory_space<vmem>>, %arg5: memref<8x2048xf32, #tpu.memory_space<vmem>>, %arg6: memref<1x2xf32, #tpu.memory_space<smem>>, %arg7: memref<8x2048xf32, #tpu.memory_space<vmem>>, %arg8: memref<8x2048xf32, #tpu.memory_space<vmem>>) attributes {dimension_semantics = [#tpu.dimension_semantics<parallel>, #tpu.dimension_semantics<arbitrary>], iteration_bounds = array<i64: 1, 1>, scalar_prefetch = 0 : i64, scratch_operands = 2 : i64, tpu.core_type = #tpu.core_type<tc>, window_params = [{transform_indices = @transform_0, window_bounds = array<i64: 8, 2048>}, {transform_indices = @transform_1, window_bounds = array<i64: 8, 2048>}, {transform_indices = @transform_2, window_bounds = array<i64: 8, 2048>}, {transform_indices = @transform_3, window_bounds = array<i64: 8, 2048>}, {transform_indices = @transform_4, window_bounds = array<i64: 1, 2>}]} {
    %c0_i32 = arith.constant 0 : i32
    %0 = arith.cmpi eq, %arg1, %c0_i32 : i32
    %1 = arith.extui %0 : i1 to i32
    %c0_i32_0 = arith.constant 0 : i32
    %2 = arith.cmpi ne, %1, %c0_i32_0 : i32
    scf.if %2 {
      %cst_19 = arith.constant 0.000000e+00 : f32
      %26 = vector.broadcast %cst_19 : f32 to vector<8x2048xf32>
      %c0_20 = arith.constant 0 : index
      %c0_21 = arith.constant 0 : index
      %27 = vector.load %arg7[%c0_20, %c0_21] : memref<8x2048xf32, #tpu.memory_space<vmem>>, vector<8x2048xf32>
      tpu.vector_store %arg7[%c0_20, %c0_21], %26 {strides = array<i32>} : memref<8x2048xf32, #tpu.memory_space<vmem>>, vector<8x2048xf32>,
      %cst_22 = arith.constant 0.000000e+00 : f32
      %28 = vector.broadcast %cst_22 : f32 to vector<8x2048xf32>
      %c0_23 = arith.constant 0 : index
      %c0_24 = arith.constant 0 : index
      %29 = vector.load %arg8[%c0_23, %c0_24] : memref<8x2048xf32, #tpu.memory_space<vmem>>, vector<8x2048xf32>
      tpu.vector_store %arg8[%c0_23, %c0_24], %28 {strides = array<i32>} : memref<8x2048xf32, #tpu.memory_space<vmem>>, vector<8x2048xf32>,
    } else {
    }
    %c0 = arith.constant 0 : index
    %c0_1 = arith.constant 0 : index
    %3 = vector.load %arg2[%c0, %c0_1] : memref<8x2048xf32, #tpu.memory_space<vmem>>, vector<8x2048xf32>
    %c0_2 = arith.constant 0 : index
    %c0_3 = arith.constant 0 : index
    %4 = vector.load %arg3[%c0_2, %c0_3] : memref<8x2048xf32, #tpu.memory_space<vmem>>, vector<8x2048xf32>
    %c0_4 = arith.constant 0 : index
    %c0_5 = arith.constant 0 : index
    %5 = vector.load %arg4[%c0_4, %c0_5] : memref<8x2048xf32, #tpu.memory_space<vmem>>, vector<8x2048xf32>
    %c0_6 = arith.constant 0 : index
    %c0_7 = arith.constant 0 : index
    %6 = vector.load %arg5[%c0_6, %c0_7] : memref<8x2048xf32, #tpu.memory_space<vmem>>, vector<8x2048xf32>
    %7 = arith.subf %3, %4 : vector<8x2048xf32>
    %8 = arith.mulf %7, %7 : vector<8x2048xf32>
    %9 = arith.mulf %5, %5 : vector<8x2048xf32>
    %10 = arith.subf %6, %9 : vector<8x2048xf32>
    %11 = math.exp %6 : vector<8x2048xf32>
    %12 = arith.subf %10, %11 : vector<8x2048xf32>
    %c0_8 = arith.constant 0 : index
    %c0_9 = arith.constant 0 : index
    %13 = vector.load %arg7[%c0_8, %c0_9] : memref<8x2048xf32, #tpu.memory_space<vmem>>, vector<8x2048xf32>
    %14 = vector.shape_cast %8 : vector<8x2048xf32> to vector<1x8x2048xf32>
    %cst = arith.constant dense<0.000000e+00> : vector<8x2048xf32>
    %15 = vector.multi_reduction <add>, %14, %cst [0] : vector<1x8x2048xf32> to vector<8x2048xf32>
    %16 = arith.addf %13, %15 : vector<8x2048xf32>
    %c0_10 = arith.constant 0 : index
    %c0_11 = arith.constant 0 : index
    %17 = vector.load %arg7[%c0_10, %c0_11] : memref<8x2048xf32, #tpu.memory_space<vmem>>, vector<8x2048xf32>
    tpu.vector_store %arg7[%c0_10, %c0_11], %16 {strides = array<i32>} : memref<8x2048xf32, #tpu.memory_space<vmem>>, vector<8x2048xf32>,
    %c0_12 = arith.constant 0 : index
    %c0_13 = arith.constant 0 : index
    %18 = vector.load %arg8[%c0_12, %c0_13] : memref<8x2048xf32, #tpu.memory_space<vmem>>, vector<8x2048xf32>
    %19 = vector.shape_cast %12 : vector<8x2048xf32> to vector<1x8x2048xf32>
    %cst_14 = arith.constant dense<0.000000e+00> : vector<8x2048xf32>
    %20 = vector.multi_reduction <add>, %19, %cst_14 [0] : vector<1x8x2048xf32> to vector<8x2048xf32>
    %21 = arith.addf %18, %20 : vector<8x2048xf32>
    %c0_15 = arith.constant 0 : index
    %c0_16 = arith.constant 0 : index
    %22 = vector.load %arg8[%c0_15, %c0_16] : memref<8x2048xf32, #tpu.memory_space<vmem>>, vector<8x2048xf32>
    tpu.vector_store %arg8[%c0_15, %c0_16], %21 {strides = array<i32>} : memref<8x2048xf32, #tpu.memory_space<vmem>>, vector<8x2048xf32>,
    %c0_i32_17 = arith.constant 0 : i32
    %23 = arith.cmpi eq, %arg1, %c0_i32_17 : i32
    %24 = arith.extui %23 : i1 to i32
    %c0_i32_18 = arith.constant 0 : i32
    %25 = arith.cmpi ne, %24, %c0_i32_18 : i32
    scf.if %25 {
      %c0_19 = arith.constant 0 : index
      %c0_20 = arith.constant 0 : index
      %26 = vector.load %arg7[%c0_19, %c0_20] : memref<8x2048xf32, #tpu.memory_space<vmem>>, vector<8x2048xf32>
      %27 = vector.shape_cast %26 : vector<8x2048xf32> to vector<1x8x2048xf32>
      %cst_21 = arith.constant dense<0.000000e+00> : vector<1xf32>
      %28 = vector.multi_reduction <add>, %27, %cst_21 [1, 2] : vector<1x8x2048xf32> to vector<1xf32>
      %29 = vector.shape_cast %28 : vector<1xf32> to vector<1x1x1xf32>
      %30 = vector.extract %29[0, 0, 0] : f32 from vector<1x1x1xf32>
      %c0_22 = arith.constant 0 : index
      %c0_23 = arith.constant 0 : index
      %31 = memref.load %arg6[%c0_22, %c0_23] : memref<1x2xf32, #tpu.memory_space<smem>>
      memref.store %30, %arg6[%c0_22, %c0_23] : memref<1x2xf32, #tpu.memory_space<smem>>
      %c0_24 = arith.constant 0 : index
      %c0_25 = arith.constant 0 : index
      %32 = vector.load %arg8[%c0_24, %c0_25] : memref<8x2048xf32, #tpu.memory_space<vmem>>, vector<8x2048xf32>
      %33 = vector.shape_cast %32 : vector<8x2048xf32> to vector<1x8x2048xf32>
      %cst_26 = arith.constant dense<0.000000e+00> : vector<1xf32>
      %34 = vector.multi_reduction <add>, %33, %cst_26 [1, 2] : vector<1x8x2048xf32> to vector<1xf32>
      %35 = vector.shape_cast %34 : vector<1xf32> to vector<1x1x1xf32>
      %36 = vector.extract %35[0, 0, 0] : f32 from vector<1x1x1xf32>
      %c0_27 = arith.constant 0 : index
      %c1 = arith.constant 1 : index
      %37 = memref.load %arg6[%c0_27, %c1] : memref<1x2xf32, #tpu.memory_space<smem>>
      memref.store %36, %arg6[%c0_27, %c1] : memref<1x2xf32, #tpu.memory_space<smem>>
    } else {
    }
    return
  }
  func.func @transform_0(%arg0: i32, %arg1: i32) -> (i32, i32) {
    %c1_i32 = arith.constant 1 : i32
    %0 = arith.muli %arg0, %c1_i32 : i32
    %1 = arith.addi %0, %arg1 : i32
    %c0_i32 = arith.constant 0 : i32
    %c0_i32_0 = arith.constant 0 : i32
    return %1, %c0_i32 : i32, i32
  }
  func.func @transform_1(%arg0: i32, %arg1: i32) -> (i32, i32) {
    %c1_i32 = arith.constant 1 : i32
    %0 = arith.muli %arg0, %c1_i32 : i32
    %1 = arith.addi %0, %arg1 : i32
    %c0_i32 = arith.constant 0 : i32
    %c0_i32_0 = arith.constant 0 : i32
    return %1, %c0_i32 : i32, i32
  }
  func.func @transform_2(%arg0: i32, %arg1: i32) -> (i32, i32) {
    %c1_i32 = arith.constant 1 : i32
    %0 = arith.muli %arg0, %c1_i32 : i32
    %1 = arith.addi %0, %arg1 : i32
    %c0_i32 = arith.constant 0 : i32
    %c0_i32_0 = arith.constant 0 : i32
    return %1, %c0_i32 : i32, i32
  }
  func.func @transform_3(%arg0: i32, %arg1: i32) -> (i32, i32) {
    %c1_i32 = arith.constant 1 : i32
    %0 = arith.muli %arg0, %c1_i32 : i32
    %1 = arith.addi %0, %arg1 : i32
    %c0_i32 = arith.constant 0 : i32
    %c0_i32_0 = arith.constant 0 : i32
    return %1, %c0_i32 : i32, i32
  }
  func.func @transform_4(%arg0: i32, %arg1: i32) -> (i32, i32) {
    %c0_i32 = arith.constant 0 : i32
    %c0_i32_0 = arith.constant 0 : i32
    return %arg0, %c0_i32 : i32, i32
  }
}

</mosaic_0001>

<bundles_post_ra>
// kernel: tpu_custom_call.1
= control target key start
LH: loop header
LB: loop body
LE: loop exit
PB: predicated region body
PF: predicated region fallthrough
CT: control target
= control target key end

     0   :  { %9 = vsyncpa [#allocation5], 0  ;;  %s774_s0 = inlined_call_operand.hbm [shape: f32[8,2048], index: 0, kind: input, shape index: {}]   ;;  %s775_s1 = inlined_call_operand.hbm [shape: f32[8,2048], index: 1, kind: input, shape index: {}]   ;;  %s776_s2 = inlined_call_operand.hbm [shape: f32[8,2048], index: 2, kind: input, shape index: {}]   ;;  %s777_s3 = inlined_call_operand.hbm [shape: f32[8,2048], index: 3, kind: input, shape index: {}]   ;;  %s778_s4 = inlined_call_operand.hbm [shape: f32[1,2], index: 4, kind: output, shape index: {}]  }
   0x1   :  { %10 = vsyncpa [#allocation8], 0 }
   0x2   :  { %11 = vsyncpa [#allocation11], 0 }
   0x3   :  { %12 = vsyncpa [#allocation6], 0  ;;  %s665_s15 = smov [#allocation7]   ;;  %s666_s17 = smov [#allocation4]  }
   0x4   :  { %s37_s16 = sshll.u32 %s665_s15, 4  ;;  %s23_s18 = sshll.u32 %s666_s17, 4  ;;  %s38_s16 = int_to_ptr.vmem [resolvable:$true] %s37_s16  ;;  %s24_s18 = int_to_ptr.vmem [resolvable:$true] %s23_s18 }
   0x5   :  { %s577_s19 = scalar_lea.vmem %s38_s16, 2048  ;;  %p582_p1 = scmp.lt.s32.totalorder %s38_s16, %s38_s16 }
   0x6   :  { %p578_p0 = scmp.ne.s32.totalorder %s38_s16, %s577_s19  ;;  %p583_p2 = scmp.lt.s32.totalorder %s577_s19, %s577_s19 }
   0x8   :  { %p584_p3 = por %p583_p2, %p582_p1 }
   0xa   :  { %p585_p4 = pnand %p584_p3, %p578_p0 }
   0xc   :  { %588 = shalt.err (!%p585_p4)
}
   0xd   :  { %40 = dma.hbm_to_vmem [thread:$0]  %s775_s1, 2048, %s38_s16, [#allocation8]  }
   0xe   :  { %s597_s22 = scalar_lea.vmem %s24_s18, 2048  ;;  %p602_p6 = scmp.lt.s32.totalorder %s24_s18, %s24_s18 }
   0xf   :  { %p598_p5 = scmp.ne.s32.totalorder %s24_s18, %s597_s22  ;;  %p603_p7 = scmp.lt.s32.totalorder %s597_s22, %s597_s22 }
  0x11   :  { %p604_p8 = por %p603_p7, %p602_p6 }
  0x13   :  { %p605_p9 = pnand %p604_p8, %p598_p5 }
  0x15   :  { %608 = shalt.err (!%p605_p9)
}
  0x16   :  { %26 = dma.hbm_to_vmem [thread:$0]  %s774_s0, 2048, %s24_s18, [#allocation5]  }
  0x17   :  { %s667_s25 = smov [#allocation9]   ;;  %s668_s27 = smov [#allocation10]  }
  0x18   :  { %s51_s26 = sshll.u32 %s667_s25, 4  ;;  %s65_s28 = sshll.u32 %s668_s27, 4  ;;  %s52_s26 = int_to_ptr.vmem [resolvable:$true] %s51_s26  ;;  %s66_s28 = int_to_ptr.vmem [resolvable:$true] %s65_s28 }
  0x19   :  { %s617_s29 = scalar_lea.vmem %s52_s26, 2048  ;;  %p622_p11 = scmp.lt.s32.totalorder %s52_s26, %s52_s26 }
  0x1a   :  { %p618_p10 = scmp.ne.s32.totalorder %s52_s26, %s617_s29  ;;  %p623_p12 = scmp.lt.s32.totalorder %s617_s29, %s617_s29 }
  0x1c   :  { %p624_p13 = por %p623_p12, %p622_p11 }
  0x1e   :  { %p625_p0 = pnand %p624_p13, %p618_p10 }
  0x20   :  { %628 = shalt.err (!%p625_p0)
}
  0x21   :  { %54 = dma.hbm_to_vmem [thread:$0]  %s776_s2, 2048, %s52_s26, [#allocation8]  }
  0x22   :  { %s637_s5 = scalar_lea.vmem %s66_s28, 2048  ;;  %p642_p2 = scmp.lt.s32.totalorder %s66_s28, %s66_s28 }
  0x23   :  { %p638_p1 = scmp.ne.s32.totalorder %s66_s28, %s637_s5  ;;  %p643_p3 = scmp.lt.s32.totalorder %s637_s5, %s637_s5 }
  0x25   :  { %p644_p4 = por %p643_p3, %p642_p2 }
  0x27   :  { %p645_p5 = pnand %p644_p4, %p638_p1 }
  0x29   :  { %648 = shalt.err (!%p645_p5)
}
  0x2a   :  { %68 = dma.hbm_to_vmem [thread:$0]  %s777_s3, 2048, %s66_s28, [#allocation11]  }
  0x2b   :  { %657 = dma.done.wait [#allocation5], 2048  }
  0x2c   :  { %658 = vsyncadd [#allocation5], 4294965248 }
  0x2d   :  { %659 = dma.done.wait [#allocation8], 4096  }
  0x2e   :  { %660 = vsyncadd [#allocation8], 4294963200 }
  0x2f   :  { %661 = dma.done.wait [#allocation11], 2048  }
  0x30   :  { %662 = vsyncadd [#allocation11], 4294965248  ;;  %v121_v0 = vld [vmem:[#allocation4] sm:$0xff]  ;;  %v122_v1 = vld [vmem:[#allocation4 + $0x8] sm:$0xff]  ;;  %s669_s7 = smov [#allocation12]  }
  0x31   :  { %v123_v2 = vld [vmem:[#allocation4 + $0x10] sm:$0xff]  ;;  %v137_v3 = vld [vmem:[#allocation7] sm:$0xff]  ;;  %v138_v4 = vld [vmem:[#allocation7 + $0x8] sm:$0xff] }
  0x32   :  { %v139_v5 = vld [vmem:[#allocation7 + $0x10] sm:$0xff]  ;;  %v185_v6 = vsub.f32 %v121_v0, %v137_v3  ;;  %v186_v7 = vsub.f32 %v122_v1, %v138_v4  ;;  %v124_v8 = vld [vmem:[#allocation4 + $0x18] sm:$0xff]  ;;  %v125_v11 = vld [vmem:[#allocation4 + $0x20] sm:$0xff] }
  0x33   :  { %v140_v9 = vld [vmem:[#allocation7 + $0x18] sm:$0xff]  ;;  %v187_v10 = vsub.f32 %v123_v2, %v139_v5  ;;  %v141_v12 = vld [vmem:[#allocation7 + $0x20] sm:$0xff]  ;;  %v126_v16 = vld [vmem:[#allocation4 + $0x28] sm:$0xff] }
  0x34   :  { %v188_v13 = vsub.f32 %v124_v8, %v140_v9  ;;  %v201_v14 = vmul.f32 %v185_v6, %v185_v6  ;;  %v202_v15 = vmul.f32 %v186_v7, %v186_v7  ;;  %v142_v17 = vld [vmem:[#allocation7 + $0x28] sm:$0xff]  ;;  %v189_v18 = vsub.f32 %v125_v11, %v141_v12  ;;  %v127_v20 = vld [vmem:[#allocation4 + $0x30] sm:$0xff]  ;;  %v128_v25 = vld [vmem:[#allocation4 + $0x38] sm:$0xff] }
  0x35   :  { %v203_v19 = vmul.f32 %v187_v10, %v187_v10  ;;  %v143_v21 = vld [vmem:[#allocation7 + $0x30] sm:$0xff]  ;;  %v190_v22 = vsub.f32 %v126_v16, %v142_v17  ;;  %v144_v26 = vld [vmem:[#allocation7 + $0x38] sm:$0xff]  ;;  %v129_v27 = vld [vmem:[#allocation4 + $0x40] sm:$0xff] }
  0x36   :  { %v204_v23 = vmul.f32 %v188_v13, %v188_v13  ;;  %v444_v24 = vadd.f32 %v202_v15, %v201_v14  ;;  %v145_v28 = vld [vmem:[#allocation7 + $0x40] sm:$0xff]  ;;  %v191_v29 = vsub.f32 %v127_v20, %v143_v21  ;;  %v205_v30 = vmul.f32 %v189_v18, %v189_v18  ;;  %v130_v35 = vld [vmem:[#allocation4 + $0x48] sm:$0xff]  ;;  %v131_v38 = vld [vmem:[#allocation4 + $0x50] sm:$0xff] }
  0x37   :  { %v192_v32 = vsub.f32 %v128_v25, %v144_v26  ;;  %v206_v33 = vmul.f32 %v190_v22, %v190_v22  ;;  %v146_v36 = vld [vmem:[#allocation7 + $0x48] sm:$0xff]  ;;  %v193_v37 = vsub.f32 %v129_v27, %v145_v28  ;;  %v147_v39 = vld [vmem:[#allocation7 + $0x50] sm:$0xff]  ;;  %v707_v42 = vld [vmem:[#allocation10] sm:$0xff] }
  0x38   :  { %v445_v31 = vadd.f32 %v444_v24, %v203_v19  ;;  %v207_v40 = vmul.f32 %v191_v29, %v191_v29  ;;  %v709_v43 = vld [vmem:[#allocation10 + $0x8] sm:$0xff]  ;;  %v711_v44 = vld [vmem:[#allocation10 + $0x10] sm:$0xff]  ;;  %v132_v45 = vld [vmem:[#allocation4 + $0x58] sm:$0xff]  ;;  %v194_v47 = vsub.f32 %v130_v35, %v146_v36  ;;  %v195_v51 = vsub.f32 %v131_v38, %v147_v39 }
  0x39   :  { %v148_v46 = vld [vmem:[#allocation7 + $0x58] sm:$0xff]  ;;  %v208_v48 = vmul.f32 %v192_v32, %v192_v32  ;;  %v209_v52 = vmul.f32 %v193_v37, %v193_v37  ;;  %v715_v53 = vld [vmem:[#allocation10 + $0x20] sm:$0xff]  ;;  %v717_v54 = vld [vmem:[#allocation10 + $0x28] sm:$0xff]  ;;  %v249_v56 = vmul.f32 1.442695, %v707_v42 }
  0x3a   :  { %v446_v34 = vadd.f32 %v445_v31, %v204_v23  ;;  %v713_v50 = vld [vmem:[#allocation10 + $0x18] sm:$0xff]  ;;  %v251_v57 = vmul.f32 1.442695, %v709_v43  ;;  %v253_v58 = vmul.f32 1.442695, %v711_v44  ;;  %v133_v59 = vld [vmem:[#allocation4 + $0x60] sm:$0xff]  ;;  %v196_v61 = vsub.f32 %v132_v45, %v148_v46 }
  0x3b   :  { %v149_v60 = vld [vmem:[#allocation7 + $0x60] sm:$0xff]  ;;  %v255_v62 = vmul.f32 1.442695, %v713_v50  ;;  %v210_v63 = vmul.f32 %v194_v47, %v194_v47  ;;  %v723_v1 = vld [vmem:[#allocation10 + $0x30] sm:$0xff]  ;;  %537 = vpow2.f32 %v249_v56  ;;  %v257_v2 = vmul.f32 1.442695, %v715_v53 }
  0x3c   :  { %v447_v41 = vadd.f32 %v446_v34, %v205_v30  ;;  %v134_v3 = vld [vmem:[#allocation4 + $0x68] sm:$0xff]  ;;  %539 = vpow2.f32 %v251_v57  ;;  %v259_v5 = vmul.f32 1.442695, %v717_v54  ;;  %v197_v6 = vsub.f32 %v133_v59, %v149_v60  ;;  %v727_v9 = vld [vmem:[#allocation10 + $0x38] sm:$0xff]  ;;  %v135_v10 = vld [vmem:[#allocation4 + $0x70] sm:$0xff] }
  0x3d   :  { %v150_v4 = vld [vmem:[#allocation7 + $0x68] sm:$0xff]  ;;  %v211_v7 = vmul.f32 %v195_v51, %v195_v51  ;;  %541 = vpow2.f32 %v253_v58  ;;  %v151_v11 = vld [vmem:[#allocation7 + $0x70] sm:$0xff]  ;;  %v153_v12 = vld [vmem:[#allocation9] sm:$0xff]  ;;  %v261_v13 = vmul.f32 1.442695, %v723_v1  ;;  %v212_v15 = vmul.f32 %v196_v61, %v196_v61 }
  0x3e   :  { %v448_v49 = vadd.f32 %v447_v41, %v206_v33  ;;  %543 = vpow2.f32 %v255_v62  ;;  %v198_v14 = vsub.f32 %v134_v3, %v150_v4  ;;  %v154_v17 = vld [vmem:[#allocation9 + $0x8] sm:$0xff]  ;;  %v730_v18 = vld [vmem:[#allocation10 + $0x40] sm:$0xff]  ;;  %v136_v19 = vld [vmem:[#allocation4 + $0x78] sm:$0xff]  ;;  %v263_v22 = vmul.f32 1.442695, %v727_v9 }
  0x3f   :  { %545 = vpow2.f32 %v257_v2  ;;  %v152_v20 = vld [vmem:[#allocation7 + $0x78] sm:$0xff]  ;;  %v155_v21 = vld [vmem:[#allocation9 + $0x10] sm:$0xff]  ;;  %v199_v23 = vsub.f32 %v135_v10, %v151_v11  ;;  %v213_v24 = vmul.f32 %v197_v6, %v197_v6  ;;  %v733_v27 = vld [vmem:[#allocation10 + $0x48] sm:$0xff]  ;;  %v217_v28 = vmul.f32 %v153_v12, %v153_v12 }
  0x40   :  { %v449_v55 = vadd.f32 %v448_v49, %v207_v40  ;;  %547 = vpow2.f32 %v259_v5  ;;  %v156_v26 = vld [vmem:[#allocation9 + $0x18] sm:$0xff]  ;;  %v218_v29 = vmul.f32 %v154_v17, %v154_v17  ;;  %v265_v30 = vmul.f32 1.442695, %v730_v18  ;;  %v157_v34 = vld [vmem:[#allocation9 + $0x20] sm:$0xff]  ;;  %v736_v35 = vld [vmem:[#allocation10 + $0x50] sm:$0xff] }
  0x41   :  { %549 = vpow2.f32 %v261_v13  ;;  %v200_v31 = vsub.f32 %v136_v19, %v152_v20  ;;  %v214_v32 = vmul.f32 %v198_v14, %v198_v14  ;;  %v219_v36 = vmul.f32 %v155_v21, %v155_v21  ;;  %v158_v37 = vld [vmem:[#allocation9 + $0x28] sm:$0xff]  ;;  %v739_v45 = vld [vmem:[#allocation10 + $0x58] sm:$0xff]  ;;  %v159_v47 = vld [vmem:[#allocation9 + $0x30] sm:$0xff] }
  0x42   :  { %v450_v0 = vadd.f32 %v449_v55, %v208_v48  ;;  %v220_v38 = vmul.f32 %v156_v26, %v156_v26  ;;  %551 = vpow2.f32 %v263_v22  ;;  %v267_v39 = vmul.f32 1.442695, %v733_v27  ;;  %v744_v56 = vld [vmem:[#allocation10 + $0x60] sm:$0xff]  ;;  %v160_v60 = vld [vmem:[#allocation9 + $0x38] sm:$0xff]  ;;  %v162_v14 = vld [vmem:[#allocation9 + $0x48] sm:$0xff] }
  0x43   :  { %v215_v40 = vmul.f32 %v199_v23, %v199_v23  ;;  %v233_v46 = vsub.f32 %v707_v42, %v217_v28  ;;  %v221_v48 = vmul.f32 %v157_v34, %v157_v34  ;;  %v234_v49 = vsub.f32 %v709_v43, %v218_v29  ;;  %v749_v43 = vld [vmem:[#allocation10 + $0x68] sm:$0xff]  ;;  %v161_v4 = vld [vmem:[#allocation9 + $0x40] sm:$0xff]  ;;  %v757_v19 = vld [vmem:[#allocation10 + $0x78] sm:$0xff] }
  0x44   :  { %v451_v8 = vadd.f32 %v450_v0, %v209_v52  ;;  %553 = vpow2.f32 %v265_v30  ;;  %v269_v51 = vmul.f32 1.442695, %v736_v35  ;;  %v216_v52 = vmul.f32 %v200_v31, %v200_v31  ;;  %v163_v22 = vld [vmem:[#allocation9 + $0x50] sm:$0xff]  ;;  %v164_v29 = vld [vmem:[#allocation9 + $0x58] sm:$0xff] }
  0x45   :  { %v222_v57 = vmul.f32 %v158_v37, %v158_v37  ;;  %v235_v58 = vsub.f32 %v711_v44, %v219_v36  ;;  %v236_v61 = vsub.f32 %v713_v50, %v220_v38  ;;  %555 = vpow2.f32 %v267_v39  ;;  %v753_v50 = vld [vmem:[#allocation10 + $0x70] sm:$0xff]  ;;  %v165_v39 = vld [vmem:[#allocation9 + $0x60] sm:$0xff] }
  0x46   :  { %v452_v16 = vadd.f32 %v451_v8, %v210_v63  ;;  %v271_v42 = vmul.f32 1.442695, %v739_v45  ;;  %v223_v0 = vmul.f32 %v159_v47, %v159_v47  ;;  %v237_v5 = vsub.f32 %v715_v53, %v221_v48  ;;  %v166_v48 = vld [vmem:[#allocation9 + $0x68] sm:$0xff] }
  0x47   :  { %557 = vpow2.f32 %v269_v51  ;;  %v273_v44 = vmul.f32 1.442695, %v744_v56  ;;  %v224_v10 = vmul.f32 %v160_v60, %v160_v60  ;;  %v238_v11 = vsub.f32 %v717_v54, %v222_v57 }
  0x48   :  { %v453_v25 = vadd.f32 %v452_v16, %v211_v7  ;;  %v538_v59 = vpop.eup %537  ;;  %559 = vpow2.f32 %v271_v42  ;;  %v225_v20 = vmul.f32 %v161_v4, %v161_v4  ;;  %v239_v21 = vsub.f32 %v723_v1, %v223_v0 }
  0x49   :  { %v540_v62 = vpop.eup %539  ;;  %v281_v2 = vsub.f32 %v233_v46, %v538_v59  ;;  %561 = vpow2.f32 %v273_v44  ;;  %v277_v23 = vmul.f32 1.442695, %v753_v50  ;;  %v226_v26 = vmul.f32 %v162_v14, %v162_v14 }
  0x4a   :  { %v454_v33 = vadd.f32 %v453_v25, %v212_v15  ;;  %v542_v3 = vpop.eup %541  ;;  %v282_v6 = vsub.f32 %v234_v49, %v540_v62  ;;  %v275_v15 = vmul.f32 1.442695, %v749_v43  ;;  %v240_v28 = vsub.f32 %v727_v9, %v224_v10  ;;  %v168_v62 = vld [vmem:[#allocation9 + $0x78] sm:$0xff] }
  0x4b   :  { %v544_v7 = vpop.eup %543  ;;  %v283_v12 = vsub.f32 %v235_v58, %v542_v3  ;;  %v279_v30 = vmul.f32 1.442695, %v757_v19  ;;  %v227_v34 = vmul.f32 %v163_v22, %v163_v22  ;;  %v241_v1 = vsub.f32 %v730_v18, %v225_v20  ;;  %v167_v18 = vld [vmem:[#allocation9 + $0x70] sm:$0xff] }
  0x4c   :  { %v455_v41 = vadd.f32 %v454_v33, %v213_v24  ;;  %v546_v13 = vpop.eup %545  ;;  %v284_v16 = vsub.f32 %v236_v61, %v544_v7  ;;  %v486_v17 = vadd.f32 %v282_v6, %v281_v2  ;;  %563 = vpow2.f32 %v275_v15 }
  0x4d   :  { %v548_v53 = vpop.eup %547  ;;  %v285_v54 = vsub.f32 %v237_v5, %v546_v13  ;;  %565 = vpow2.f32 %v277_v23  ;;  %v229_v49 = vmul.f32 %v165_v39, %v165_v39  ;;  %v243_v51 = vsub.f32 %v736_v35, %v227_v34 }
  0x4e   :  { %v456_v55 = vadd.f32 %v455_v41, %v214_v32  ;;  %v487_v24 = vadd.f32 %v486_v17, %v283_v12  ;;  %v550_v25 = vpop.eup %549  ;;  %v286_v31 = vsub.f32 %v238_v11, %v548_v53  ;;  %v242_v41 = vsub.f32 %v733_v27, %v226_v26 }
  0x4f   :  { %v552_v33 = vpop.eup %551  ;;  %v287_v36 = vsub.f32 %v239_v21, %v550_v25  ;;  %567 = vpow2.f32 %v279_v30  ;;  %v230_v58 = vmul.f32 %v166_v48, %v166_v48  ;;  %v231_v27 = vmul.f32 %v167_v18, %v167_v18 }
  0x50   :  { %v457_v63 = vadd.f32 %v456_v55, %v215_v40  ;;  %v488_v32 = vadd.f32 %v487_v24, %v284_v16  ;;  %v228_v40 = vmul.f32 %v164_v29, %v164_v29  ;;  %v288_v9 = vsub.f32 %v240_v28, %v552_v33 }
  0x51   :  { %v554_v38 = vpop.eup %553  ;;  %v232_v4 = vmul.f32 %v168_v62, %v168_v62  ;;  %v246_v35 = vsub.f32 %v749_v43, %v230_v58  ;;  %v247_v7 = vsub.f32 %v753_v50, %v231_v27 }
  0x52   :  { %v458_v8 = vadd.f32 %v457_v63, %v216_v52  ;;  %v489_v37 = vadd.f32 %v488_v32, %v285_v54  ;;  %v556_v47 = vpop.eup %555  ;;  %v289_v52 = vsub.f32 %v241_v1, %v554_v38  ;;  %v244_v59 = vsub.f32 %v739_v45, %v228_v40 }
  0x53   :  { %v290_v60 = vsub.f32 %v242_v41, %v556_v47  ;;  %v245_v63 = vsub.f32 %v744_v56, %v229_v49  ;;  %v248_v11 = vsub.f32 %v757_v19, %v232_v4 }
  0x54   :  { %459 = vadd.xlane.f32.xlu0 %v458_v8  ;;  %v490_v46 = vadd.f32 %v489_v37, %v286_v31  ;;  %v558_v57 = vpop.eup %557 }
  0x55   :  { %v560_v42 = vpop.eup %559  ;;  %v291_v0 = vsub.f32 %v243_v51, %v558_v57 }
  0x56   :  { %v491_v55 = vadd.f32 %v490_v46, %v287_v36  ;;  %v562_v3 = vpop.eup %561  ;;  %v292_v5 = vsub.f32 %v244_v59, %v560_v42 }
  0x57   :  { %v293_v8 = vsub.f32 %v245_v63, %v562_v3 }
  0x58   :  { %v492_v61 = vadd.f32 %v491_v55, %v288_v9 }
  0x59   :  { %v564_v6 = vpop.eup %563 }
  0x5a   :  { %v493_v2 = vadd.f32 %v492_v61, %v289_v52  ;;  %v566_v10 = vpop.eup %565  ;;  %v294_v12 = vsub.f32 %v246_v35, %v564_v6 }
  0x5b   :  { %v295_v56 = vsub.f32 %v247_v7, %v566_v10 }
  0x5c   :  { %v494_v44 = vadd.f32 %v493_v2, %v290_v60  ;;  %v568_v14 = vpop.eup %567 }
  0x5d   :  { %v296_v16 = vsub.f32 %v248_v11, %v568_v14 }
  0x5e   :  { %v495_v45 = vadd.f32 %v494_v44, %v291_v0 }
  0x60   :  { %v496_v13 = vadd.f32 %v495_v45, %v292_v5 }
  0x62   :  { %v497_v15 = vadd.f32 %v496_v13, %v293_v8 }
  0x64   :  { %v498_v17 = vadd.f32 %v497_v15, %v294_v12 }
  0x66   :  { %v499_v53 = vadd.f32 %v498_v17, %v295_v56 }
  0x68   :  { %v500_v20 = vadd.f32 %v499_v53, %v296_v16 }
  0x6a   :  { %501 = vadd.xlane.f32.xlu0 %v500_v20 }
  0xdd   :  { %v460_v43 = vpop.xlane.xlu0 %459 }
  0xde   :  { %v461_v21 = vrot.slane %v460_v43, 4 }
  0xe0   :  { %v462_v22 = vadd.f32 %v461_v21, %v460_v43 }
  0xe2   :  { %v463_v23 = vrot.slane %v462_v22, 2 }
  0xe4   :  { %v464_v50 = vadd.f32 %v463_v23, %v462_v22 }
  0xe6   :  { %v465_v54 = vrot.slane %v464_v50, 1 }
  0xe8   :  { %v466_v24 = vadd.f32 %v465_v54, %v464_v50 }
  0xea   :  { %528 = vpush %v466_v24 }
  0xf3   :  { %v502_v25 = vpop.xlane.xlu0 %501 }
  0xf4   :  { %v503_v19 = vrot.slane %v502_v25, 4 }
  0xf6   :  { %v504_v26 = vadd.f32 %v503_v19, %v502_v25 }
  0xf8   :  { %v505_v28 = vrot.slane %v504_v26, 2 }
  0xfa   :  { %v506_v29 = vadd.f32 %v505_v28, %v504_v26 }
  0xfc   :  { %v507_v30 = vrot.slane %v506_v29, 1 }
  0xfe   :  { %v508_v31 = vadd.f32 %v507_v30, %v506_v29 }
 0x100   :  { %530 = vpush %v508_v31 }
 0x11b   :  { %s529_s2 = spop %528 }
 0x11c   :  { %469 = sst [smem:[#allocation12]] %s529_s2 }
 0x131   :  { %s531_s3 = spop %530 }
 0x132   :  { %511 = sst [smem:[#allocation12 + $0x1]] %s531_s3 }
 0x133   :  { %519 = dma.smem_to_hbm %s669_s7, 16, %s778_s4, [#allocation6]  }
 0x134   :  { %663 = dma.done.wait [#allocation6], 16  }
 0x135   :  { %664 = vsyncadd [#allocation6], 4294967280 }
 0x136   :  { %523 = sfence }
 0x137   :  { %524 = vsyncpa [#allocation5], 1 }
 0x138   :  { %525 = vsyncpa [#allocation8], 1 }
 0x139   :  { %526 = vsyncpa [#allocation11], 1 }
 0x13a   :  { %527 = vsyncpa [#allocation6], 1 }

</bundles_post_ra>
